<compile_context>
chip_gen: v5e
topology: v5e:2x2
jax: 0.10.0
libtpu: 0.0.40
codegen_flags: <defaults>
</compile_context>

<pallas_src>
import functools
import math

import jax
import jax.numpy as jnp
from jax.experimental import pallas as pl
from jax.experimental.pallas import tpu as pltpu


def _round_up(v, m):
    return ((v + m - 1) // m) * m


def _pick_tile(dim_p, cap, step):
    """Largest multiple of `step` that is <= cap and divides dim_p.

    dim_p is already a multiple of `step`, so this always terminates at
    `step` in the worst case and never forces extra padding beyond the
    step-round-up (no streaming of gratuitous zero tiles).
    """
    t = min(dim_p, max(cap, step))
    t -= t % step
    while dim_p % t != 0:
        t -= step
    return t


def _linear_bias_kernel(x_ref, w_ref, b_ref, o_ref, acc_ref):
    """One (i, j) output tile, accumulated over the k (reduction) grid axis."""
    k = pl.program_id(2)

    @pl.when(k == 0)
    def _():
        acc_ref[...] = jnp.zeros_like(acc_ref)

    # x[tm, tk] @ w[tk, tn] on the MXU (bf16 or f32 feeds, f32 accumulation).
    acc_ref[...] += jnp.dot(x_ref[...], w_ref[...],
                            preferred_element_type=jnp.float32)

    @pl.when(k == pl.num_programs(2) - 1)
    def _():
        # Bias add only in the finalize branch (hoisted out of the K loop).
        o_ref[...] = (acc_ref[...] + b_ref[...]).astype(o_ref.dtype)


def prepare_noisy_linear(weight_mu, weight_sigma, weight_epsilon,
                         bias_mu, bias_sigma, bias_epsilon, *,
                         training=True, compute_dtype=jnp.bfloat16,
                         max_tk=1024, max_tn=512):
    """One-time (per reset_noise / param update) operand preparation.

    Composes the effective weight/bias, transposes the weight to [In, Out]
    (lane-dense output), pads to 128 multiples, casts to the compute dtype and
    fixes the (tk, tn) tiling.  The result is reused across many forwards so
    none of this O(In*Out) work sits on the per-call path.
    """
    Out, In = weight_mu.shape
    In_p = _round_up(In, 128)
    Out_p = _round_up(Out, 128)

    tk = _pick_tile(In_p, max_tk, 128)
    tn = _pick_tile(Out_p, max_tn, 128)
    # v7x: if the whole output would be a single j tile, split it so both
    # TensorCores get a "parallel" tile.  Free on single-core v5e/v6e.
    if tn == Out_p and Out_p >= 256:
        tn = _pick_tile(Out_p, Out_p // 2, 128)

    if training:
        # Noise is fixed between reset_noise() calls, so composing here is
        # exactly the module's forward semantics with 1/3 of the HBM streams.
        w = weight_mu + weight_sigma * weight_epsilon
        b = bias_mu + bias_sigma * bias_epsilon
    else:
        w = weight_mu
        b = bias_mu

    w_p = jnp.pad(w.T, ((0, In_p - In), (0, Out_p - Out))).astype(compute_dtype)
    b_p = jnp.pad(b.reshape(1, Out),
                  ((0, 0), (0, Out_p - Out))).astype(jnp.float32)

    return dict(w=w_p, b=b_p, In=In, Out=Out, In_p=In_p, Out_p=Out_p,
                tk=tk, tn=tn, compute_dtype=compute_dtype)


def noisy_linear_apply(x, prepared, *, max_tm=512):
    """Hot path: y = x @ w_prepared + b_prepared  (prepared via
    prepare_noisy_linear).  Only pads/casts x per call."""
    B, In = x.shape
    assert In == prepared["In"], (In, prepared["In"])
    In_p, Out_p = prepared["In_p"], prepared["Out_p"]
    tk, tn = prepared["tk"], prepared["tn"]
    cdt = prepared["compute_dtype"]

    B_p = _round_up(B, 8)
    tm = _pick_tile(B_p, max_tm, 8)

    x_p = jnp.pad(x, ((0, B_p - B), (0, In_p - In))).astype(cdt)

    grid = (B_p // tm, Out_p // tn, In_p // tk)

    # TODO(synk): if xprof still shows exposed DMA on the weight stream for
    # short K loops, sweep pipeline_mode=pl.Buffered(3) on w_spec.
    x_spec = pl.BlockSpec((tm, tk), lambda i, j, k: (i, k))
    w_spec = pl.BlockSpec((tk, tn), lambda i, j, k: (k, j))
    b_spec = pl.BlockSpec((1, tn), lambda i, j, k: (0, j))
    o_spec = pl.BlockSpec((tm, tn), lambda i, j, k: (i, j))

    out_p = pl.pallas_call(
        _linear_bias_kernel,
        out_shape=jax.ShapeDtypeStruct((B_p, Out_p), jnp.float32),
        grid_spec=pltpu.PrefetchScalarGridSpec(
            num_scalar_prefetch=0,
            grid=grid,
            in_specs=[x_spec, w_spec, b_spec],
            out_specs=o_spec,
            scratch_shapes=[pltpu.VMEM((tm, tn), jnp.float32)],
        ),
        compiler_params=pltpu.CompilerParams(
            dimension_semantics=("parallel", "parallel", "arbitrary"),
            # Lifts v5e's 16 MiB scoped default; stays under v7x's 64 MiB
            # physical VMEM.  Actual double-buffered footprint is ~7 MiB.
            vmem_limit_bytes=48 * 1024 * 1024,
        ),
    )(x_p, prepared["w"], prepared["b"])

    return out_p[:B, :prepared["Out"]]


def noisy_linear(x, weight_mu, weight_sigma, weight_epsilon,
                 bias_mu, bias_sigma, bias_epsilon, *, training=True,
                 compute_dtype=jnp.bfloat16,
                 max_tm=512, max_tk=1024, max_tn=512):
    """Convenience wrapper (prepare + apply).  For repeated forwards with the
    same noise, call prepare_noisy_linear once and noisy_linear_apply per
    step instead."""
    prepared = prepare_noisy_linear(
        weight_mu, weight_sigma, weight_epsilon,
        bias_mu, bias_sigma, bias_epsilon,
        training=training, compute_dtype=compute_dtype,
        max_tk=max_tk, max_tn=max_tn)
    return noisy_linear_apply(x, prepared, max_tm=max_tm)


def init_noisy_linear_params(key, in_features, out_features, sigma_init=0.017):
    """Deterministic parameter init matching NoisyLinear.reset_parameters /
    reset_noise (synthetic - not a checkpoint load)."""
    k_wmu, k_bmu, k_weps, k_beps = jax.random.split(key, 4)
    mu_range = 1.0 / math.sqrt(in_features)
    weight_mu = jax.random.uniform(
        k_wmu, (out_features, in_features), jnp.float32, -mu_range, mu_range)
    weight_sigma = jnp.full((out_features, in_features),
                            sigma_init / math.sqrt(in_features), jnp.float32)
    weight_epsilon = jax.random.normal(
        k_weps, (out_features, in_features), jnp.float32)
    bias_mu = jax.random.uniform(
        k_bmu, (out_features,), jnp.float32, -mu_range, mu_range)
    bias_sigma = jnp.full((out_features,),
                          sigma_init / math.sqrt(out_features), jnp.float32)
    bias_epsilon = jax.random.normal(k_beps, (out_features,), jnp.float32)
    return (weight_mu, weight_sigma, weight_epsilon,
            bias_mu, bias_sigma, bias_epsilon)


def noisy_linear_ref(x, wmu, wsig, weps, bmu, bsig, beps, *, training=True):
    """Pure-JAX reference for correctness checking."""
    if training:
        w = wmu + wsig * weps
        b = bmu + bsig * beps
    else:
        w = wmu
        b = bmu
    return x @ w.T + b


if __name__ == "__main__":
    import numpy as np

    key = jax.random.PRNGKey(0)

    # Case 1: Rainbow-DQN-sized head, default bf16 feeds, prepared once and
    # reused (training and eval paths).
    batch, in_features, out_features = 32, 64, 32
    k_x, k_p, key = jax.random.split(key, 3)
    x = jax.random.normal(k_x, (batch, in_features), jnp.float32)
    params = init_noisy_linear_params(k_p, in_features, out_features)

    prep_train = prepare_noisy_linear(*params, training=True)
    prep_eval = prepare_noisy_linear(*params, training=False)
    y_train = jax.block_until_ready(noisy_linear_apply(x, prep_train))
    y_eval = jax.block_until_ready(noisy_linear_apply(x, prep_eval))
    np.testing.assert_allclose(
        np.asarray(y_train),
        np.asarray(noisy_linear_ref(x, *params, training=True)),
        rtol=2e-2, atol=2e-2)
    np.testing.assert_allclose(
        np.asarray(y_eval),
        np.asarray(noisy_linear_ref(x, *params, training=False)),
        rtol=2e-2, atol=2e-2)

    # Case 2: unaligned shapes, f32 compute dtype (exact vs. reference) and
    # forced-small tiles to exercise the multi-step K accumulator, padding,
    # and the multi-tile (i, j) output grid.
    batch2, in2, out2 = 16, 300, 200
    k_x2, k_p2 = jax.random.split(key)
    x2 = jax.random.normal(k_x2, (batch2, in2), jnp.float32)
    params2 = init_noisy_linear_params(k_p2, in2, out2)
    prep2 = prepare_noisy_linear(*params2, training=True,
                                 compute_dtype=jnp.float32,
                                 max_tk=128, max_tn=128)
    y2 = jax.block_until_ready(noisy_linear_apply(x2, prep2, max_tm=8))
    np.testing.assert_allclose(
        np.asarray(y2),
        np.asarray(noisy_linear_ref(x2, *params2, training=True)),
        rtol=1e-5, atol=1e-5)

    print("KERNEL_OK")
</pallas_src>

<mosaic_0001>
module attributes {stable_mosaic.version = 11 : i64} {
  func.func @_linear_bias_kernel(%arg0: i32, %arg1: i32, %arg2: i32, %arg3: memref<32x128xbf16, #tpu.memory_space<vmem>>, %arg4: memref<128x128xbf16, #tpu.memory_space<vmem>>, %arg5: memref<1x128xf32, #tpu.memory_space<vmem>>, %arg6: memref<32x128xf32, #tpu.memory_space<vmem>>, %arg7: memref<32x128xf32, #tpu.memory_space<vmem>>) attributes {dimension_semantics = [#tpu.dimension_semantics<parallel>, #tpu.dimension_semantics<parallel>, #tpu.dimension_semantics<arbitrary>], iteration_bounds = array<i64: 1, 1, 1>, scalar_prefetch = 0 : i64, scratch_operands = 1 : i64, tpu.core_type = #tpu.core_type<tc>, window_params = [{transform_indices = @transform_0, window_bounds = array<i64: 32, 128>}, {transform_indices = @transform_1, window_bounds = array<i64: 128, 128>}, {transform_indices = @transform_2, window_bounds = array<i64: 1, 128>}, {transform_indices = @transform_3, window_bounds = array<i64: 32, 128>}]} {
    %c0_i32 = arith.constant 0 : i32
    %0 = arith.cmpi eq, %arg2, %c0_i32 : i32
    %1 = arith.extui %0 : i1 to i32
    %c0_i32_0 = arith.constant 0 : i32
    %2 = arith.cmpi ne, %1, %c0_i32_0 : i32
    scf.if %2 {
      %cst_10 = arith.constant 0.000000e+00 : f32
      %12 = vector.broadcast %cst_10 : f32 to vector<32x128xf32>
      %c0_11 = arith.constant 0 : index
      %c0_12 = arith.constant 0 : index
      %13 = vector.load %arg7[%c0_11, %c0_12] : memref<32x128xf32, #tpu.memory_space<vmem>>, vector<32x128xf32>
      tpu.vector_store %arg7[%c0_11, %c0_12], %12 {strides = array<i32>} : memref<32x128xf32, #tpu.memory_space<vmem>>, vector<32x128xf32>,
    } else {
    }
    %c0 = arith.constant 0 : index
    %c0_1 = arith.constant 0 : index
    %3 = vector.load %arg7[%c0, %c0_1] : memref<32x128xf32, #tpu.memory_space<vmem>>, vector<32x128xf32>
    %c0_2 = arith.constant 0 : index
    %c0_3 = arith.constant 0 : index
    %4 = vector.load %arg3[%c0_2, %c0_3] : memref<32x128xbf16, #tpu.memory_space<vmem>>, vector<32x128xbf16>
    %c0_4 = arith.constant 0 : index
    %c0_5 = arith.constant 0 : index
    %5 = vector.load %arg4[%c0_4, %c0_5] : memref<128x128xbf16, #tpu.memory_space<vmem>>, vector<128x128xbf16>
    %cst = arith.constant dense<0.000000e+00> : vector<32x128xf32>
    %6 = tpu.matmul %4, %5, %cst {dimension_numbers = #tpu.dot_dimension_numbers<[1], [0], [0], [1], [0, 0, 1, 1], [], []>} : vector<32x128xbf16>, vector<128x128xbf16>, vector<32x128xf32> -> vector<32x128xf32>
    %7 = arith.addf %3, %6 : vector<32x128xf32>
    %c0_6 = arith.constant 0 : index
    %c0_7 = arith.constant 0 : index
    %8 = vector.load %arg7[%c0_6, %c0_7] : memref<32x128xf32, #tpu.memory_space<vmem>>, vector<32x128xf32>
    tpu.vector_store %arg7[%c0_6, %c0_7], %7 {strides = array<i32>} : memref<32x128xf32, #tpu.memory_space<vmem>>, vector<32x128xf32>,
    %c0_i32_8 = arith.constant 0 : i32
    %9 = arith.cmpi eq, %arg2, %c0_i32_8 : i32
    %10 = arith.extui %9 : i1 to i32
    %c0_i32_9 = arith.constant 0 : i32
    %11 = arith.cmpi ne, %10, %c0_i32_9 : i32
    scf.if %11 {
      %c0_10 = arith.constant 0 : index
      %c0_11 = arith.constant 0 : index
      %12 = vector.load %arg7[%c0_10, %c0_11] : memref<32x128xf32, #tpu.memory_space<vmem>>, vector<32x128xf32>
      %c0_12 = arith.constant 0 : index
      %c0_13 = arith.constant 0 : index
      %13 = vector.load %arg5[%c0_12, %c0_13] : memref<1x128xf32, #tpu.memory_space<vmem>>, vector<1x128xf32>
      %14 = vector.broadcast %13 : vector<1x128xf32> to vector<32x128xf32>
      %15 = arith.addf %12, %14 : vector<32x128xf32>
      %c0_14 = arith.constant 0 : index
      %c0_15 = arith.constant 0 : index
      %16 = vector.load %arg6[%c0_14, %c0_15] : memref<32x128xf32, #tpu.memory_space<vmem>>, vector<32x128xf32>
      tpu.vector_store %arg6[%c0_14, %c0_15], %15 {strides = array<i32>} : memref<32x128xf32, #tpu.memory_space<vmem>>, vector<32x128xf32>,
    } else {
    }
    return
  }
  func.func @transform_0(%arg0: i32, %arg1: i32, %arg2: i32) -> (i32, i32) {
    %c0_i32 = arith.constant 0 : i32
    return %arg0, %arg2 : i32, i32
  }
  func.func @transform_1(%arg0: i32, %arg1: i32, %arg2: i32) -> (i32, i32) {
    %c0_i32 = arith.constant 0 : i32
    return %arg2, %arg1 : i32, i32
  }
  func.func @transform_2(%arg0: i32, %arg1: i32, %arg2: i32) -> (i32, i32) {
    %c0_i32 = arith.constant 0 : i32
    %c0_i32_0 = arith.constant 0 : i32
    return %c0_i32, %arg1 : i32, i32
  }
  func.func @transform_3(%arg0: i32, %arg1: i32, %arg2: i32) -> (i32, i32) {
    %c0_i32 = arith.constant 0 : i32
    return %arg0, %arg1 : i32, i32
  }
}

</mosaic_0001>

<bundles_post_ra>
// kernel: tpu_custom_call.1
= control target key start
LH: loop header
LB: loop body
LE: loop exit
PB: predicated region body
PF: predicated region fallthrough
CT: control target
= control target key end

     0   :  { %8 = vsyncpa [#allocation4], 0  ;;  %s388_s0 = inlined_call_operand.hbm [shape: bf16[32,128], index: 0, kind: input, shape index: {}]   ;;  %s389_s1 = inlined_call_operand.hbm [shape: bf16[128,128], index: 1, kind: input, shape index: {}]   ;;  %s390_s2 = inlined_call_operand.vmem [shape: f32[1,128], index: 2, kind: input, shape index: {}]   ;;  %s391_s3 = inlined_call_operand.hbm [shape: f32[32,128], index: 3, kind: output, shape index: {}]  }
   0x1   :  { %9 = vsyncpa [#allocation7], 0 }
   0x2   :  { %10 = vsyncpa [#allocation5], 0  ;;  %s15_s14 = sshll.u32 %s388_s0, 4  ;;  %s349_s15 = smov [#allocation3]   ;;  %s16_s14 = int_to_ptr.hbm [resolvable:$true] %s15_s14 }
   0x3   :  { %s17_s16 = sshll.u32 %s349_s15, 4  ;;  %s28_s19 = sshll.u32 %s389_s1, 4  ;;  %s18_s16 = int_to_ptr.vmem [resolvable:$true] %s17_s16  ;;  %s29_s19 = int_to_ptr.hbm [resolvable:$true] %s28_s19 }
   0x4   :  { %s350_s20 = smov 64   ;;  %s351_s21 = smov 4  }
   0x5   :  { %23 = dma.hbm_to_vmem [thread:$0]  %s16_s14, 256, %s18_s16, [#allocation4], %s350_s20, %s350_s20, %s351_s21  }
   0x6   :  { %s352_s22 = smov [#allocation6]  }
   0x7   :  { %s30_s23 = sshll.u32 %s352_s22, 4  ;;  %s31_s23 = int_to_ptr.vmem [resolvable:$true] %s30_s23 }
   0x8   :  { %36 = dma.hbm_to_vmem [thread:$0]  %s29_s19, 1024, %s31_s23, [#allocation7], %s350_s20, %s350_s20, %s351_s21  }
   0x9   :  { %343 = dma.done.wait [#allocation4], 256  }
   0xa   :  { %344 = vsyncadd [#allocation4], 4294967040 }
   0xb   :  { %345 = dma.done.wait [#allocation7], 1024  }
   0xc   :  { %346 = vsyncadd [#allocation7], 4294966272  ;;  %v254_v0 = vld [vmem:[#allocation6 + $0x38] sm:$0xff]  ;;  %v253_v1 = vld [vmem:[#allocation6 + $0x30] sm:$0xff]  ;;  %s353_s24 = smov [#allocation8]   ;;  %s191_s28 = sshll.u32 %s391_s3, 4  ;;  %s192_s28 = int_to_ptr.hbm [resolvable:$true] %s191_s28 }
   0xd   :  { %139 = vmatpush.bf16.msra.mxu0 %v254_v0  ;;  %255 = vmatpush.bf16.msra.mxu1 %v254_v0  ;;  %v252_v2 = vld [vmem:[#allocation6 + $0x28] sm:$0xff]  ;;  %v251_v3 = vld [vmem:[#allocation6 + $0x20] sm:$0xff]  ;;  %v250_v4 = vld [vmem:[#allocation6 + $0x18] sm:$0xff]  ;;  %s189_s25 = sshll.u32 %s353_s24, 4  ;;  %s355_s29 = smov 8   ;;  %s190_s25 = int_to_ptr.vmem [resolvable:$true] %s189_s25 }
   0xe   :  { %v249_v5 = vld [vmem:[#allocation6 + $0x10] sm:$0xff]  ;;  %v248_v6 = vld [vmem:[#allocation6 + $0x8] sm:$0xff]  ;;  %v247_v7 = vld [vmem:[#allocation6] sm:$0xff] }
   0xf   :  { %v245_v8 = vld [vmem:[#allocation3] sm:$0xff]  ;;  %v246_v9 = vld [vmem:[#allocation3 + $0x8] sm:$0xff] }
  0x10   :  { %v270_v10 = vld [vmem:[%s390_s2] ss:$0 sm:$0xff]  ;;  %s354_s2 = smov 128  }
  0x11   :  { %140 = vmatpush.bf16.msra.mxu0 %v253_v1  ;;  %256 = vmatpush.bf16.msra.mxu1 %v253_v1 }
  0x15   :  { %141 = vmatpush.bf16.msra.mxu0 %v252_v2  ;;  %257 = vmatpush.bf16.msra.mxu1 %v252_v2 }
  0x19   :  { %142 = vmatpush.bf16.msra.mxu0 %v251_v3  ;;  %258 = vmatpush.bf16.msra.mxu1 %v251_v3 }
  0x1d   :  { %143 = vmatpush.bf16.msra.mxu0 %v250_v4  ;;  %259 = vmatpush.bf16.msra.mxu1 %v250_v4 }
  0x21   :  { %144 = vmatpush.bf16.msra.mxu0 %v249_v5  ;;  %260 = vmatpush.bf16.msra.mxu1 %v249_v5 }
  0x25   :  { %145 = vmatpush.bf16.msra.mxu0 %v248_v6  ;;  %261 = vmatpush.bf16.msra.mxu1 %v248_v6 }
  0x29   :  { %146 = vmatpush.bf16.msra.mxu0 %v247_v7  ;;  %262 = vmatpush.bf16.msra.mxu1 %v247_v7 }
  0x2c   :  { %147 = vmatmul.bf16.vlgmr.msra.gmra.mxu0 %v245_v8  ;;  %152 = vmatmul.bf16.vlgmr.msra.gmra.mxu1 %v246_v9 }
  0xa9   :  { %v148_v11 = vpop.f32.mrf.mxu0  ;;  %v153_v12 = vpop.f32.mrf.mxu1 }
  0xaa   :  { %v177_v13 = vadd.f32 %v270_v10, %v148_v11  ;;  %v179_v14 = vadd.f32 %v270_v10, %v153_v12 }
  0xac   :  { %181 = vst [vmem:[#allocation8] sm:$0xff] %v177_v13 }
  0xad   :  { %183 = vst [vmem:[#allocation8 + $0x10] sm:$0xff] %v179_v14 }
  0xb1   :  { %v150_v15 = vpop.f32.mrf.mxu0  ;;  %v155_v16 = vpop.f32.mrf.mxu1 }
  0xb2   :  { %v178_v17 = vadd.f32 %v270_v10, %v150_v15  ;;  %v180_v18 = vadd.f32 %v270_v10, %v155_v16 }
  0xb4   :  { %182 = vst [vmem:[#allocation8 + $0x8] sm:$0xff] %v178_v17 }
  0xb5   :  { %184 = vst [vmem:[#allocation8 + $0x18] sm:$0xff] %v180_v18 }
  0xb6   :  { %197 = dma.vmem_to_hbm [thread:$0]  %s190_s25, 512, %s192_s28, [#allocation5], %s354_s2, %s354_s2, %s355_s29  }
  0xb7   :  { %347 = dma.done.wait [#allocation5], 512  }
  0xb8   :  { %348 = vsyncadd [#allocation5], 4294966784 }
  0xb9   :  { %202 = vsyncpa [#allocation4], 1 }
  0xba   :  { %203 = vsyncpa [#allocation7], 1 }
  0xbb   :  { %204 = vsyncpa [#allocation5], 1 }

</bundles_post_ra>
